<compile_context>
chip_gen: v6e
topology: v6e:2x2x1
jax: 0.10.0
libtpu: 0.0.40
codegen_flags: <defaults>
</compile_context>

<pallas_src>
import functools

import jax
import jax.numpy as jnp
from jax.experimental import pallas as pl
from jax.experimental.pallas import tpu as pltpu


def _round_up(v, m):
    return ((v + m - 1) // m) * m


def _row_tile(n, pref=512):
    """Largest multiple-of-8 row tile <= pref that evenly divides n."""
    if n % 8 != 0:
        return n
    t = min(pref, n)
    while n % t != 0:
        t -= 8
    return t


# --------------------------- linear (encoders / head) -----------------------

def _linear_kernel(x_ref, w_ref, b_ref, o_ref, *, cast_bf16):
    x = x_ref[...]
    if cast_bf16:
        x = x.astype(jnp.bfloat16)
    y = jnp.dot(x, w_ref[...], preferred_element_type=jnp.float32) + b_ref[...]
    o_ref[...] = y.astype(o_ref.dtype)


def pallas_linear(x, w, b, *, row_tile=512, out_dtype=jnp.float32):
    """Returns the 128-lane-padded output (caller slices once if needed)."""
    n, k = x.shape
    m = w.shape[1]
    m_pad = _round_up(m, 128)                       # lane-dense output stores
    if m_pad != m:
        w = jnp.pad(w, ((0, 0), (0, m_pad - m)))
        b = jnp.pad(b, (0, m_pad - m))
    cast_bf16 = k >= 128                            # K=8 encoders stay f32
    if cast_bf16:
        w = w.astype(jnp.bfloat16)
    tn = _row_tile(n, row_tile)
    return pl.pallas_call(
        functools.partial(_linear_kernel, cast_bf16=cast_bf16),
        out_shape=jax.ShapeDtypeStruct((n, m_pad), out_dtype),
        grid=(n // tn,),
        in_specs=[
            pl.BlockSpec((tn, k), lambda i: (i, 0)),
            pl.BlockSpec((k, m_pad), lambda i: (0, 0)),
            pl.BlockSpec((1, m_pad), lambda i: (0, 0)),
        ],
        out_specs=pl.BlockSpec((tn, m_pad), lambda i: (i, 0)),
        compiler_params=pltpu.CompilerParams(dimension_semantics=("parallel",)),
        cost_estimate=pl.CostEstimate(
            flops=2 * n * k * m_pad, transcendentals=0,
            bytes_accessed=4 * (n * k + k * m_pad + n * m_pad)),
    )(x, w, b.reshape(1, m_pad))


# ------------------- GENConv aggregation (softmax + msg_norm) ----------------
# grid = (edge_tiles,) ["arbitrary" reduction]; full (N,H) denom / wsum / out
# stay resident in VMEM.  Incidence tiles built on-chip from int32 indices.
# TODO(synk): for ogbn-proteins-scale graphs shard nodes over a leading
#   "parallel" axis (v7x 2-TC) and cap tile_e from the v7x 64 MiB VMEM budget;
#   replace the dense O(E*N*H) gather with a scalar-prefetched sparse gather.

def _gen_agg_kernel(src_ref, dst_ref, r_bf16_ref, r_f32_ref, e_ref, o_ref,
                    denom_ref, wsum_ref, mx_ref, *, t, scale, n_nodes):
    j = pl.program_id(0)
    last = pl.num_programs(0) - 1

    @pl.when(j == 0)
    def _init():
        denom_ref[...] = jnp.zeros_like(denom_ref)
        wsum_ref[...] = jnp.zeros_like(wsum_ref)
        # invariant: messages = relu(.)+1e-7 > 0 and t >= 0, so a 0 init is a
        # valid (conservative) shift and every exp argument stays <= 0.
        mx_ref[...] = jnp.zeros_like(mx_ref)

    tile_e = src_ref.shape[0]
    # gather one-hot (tile_e, N) built on-chip: S[e, n] = (src[e] == n)
    src = src_ref[...]                                             # (tile_e, 1)
    iota_n = jax.lax.broadcasted_iota(jnp.int32, (tile_e, n_nodes), 1)
    s_mat = (iota_n == src).astype(jnp.bfloat16)
    xj = jnp.dot(s_mat, r_bf16_ref[...], preferred_element_type=jnp.float32)

    m = jnp.maximum(xj + e_ref[...].astype(jnp.float32), 0.0) + 1e-7
    tm = t * m
    # online per-channel running max: a constant shift within every destination
    # segment (softmax unchanged), exp argument <= 0 -> no overflow.
    tile_max = jnp.max(tm, axis=0, keepdims=True)                  # (1, H)
    new_max = jnp.maximum(mx_ref[...], tile_max)
    corr = jnp.exp(mx_ref[...] - new_max)
    p = jnp.exp(tm - new_max)

    # scatter one-hot (N, tile_e): A[n, e] = (dst[e] == n); padded edges
    # (dst == -1) match no row -> contribute nothing.
    dst = dst_ref[...]                                             # (1, tile_e)
    iota_r = jax.lax.broadcasted_iota(jnp.int32, (n_nodes, tile_e), 0)
    a_mat = (iota_r == dst).astype(jnp.bfloat16)

    denom_ref[...] = denom_ref[...] * corr + jnp.dot(
        a_mat, p.astype(jnp.bfloat16), preferred_element_type=jnp.float32)
    wsum_ref[...] = wsum_ref[...] * corr + jnp.dot(
        a_mat, (p * m).astype(jnp.bfloat16), preferred_element_type=jnp.float32)
    mx_ref[...] = new_max

    @pl.when(j == last)
    def _finalize():
        denom = denom_ref[...]
        # isolated nodes: denom == wsum == 0 -> agg == 0 (guarded, no NaN)
        agg = jnp.where(denom > 0.0,
                        wsum_ref[...] / jnp.maximum(denom, 1e-38), 0.0)
        # MessageNorm: normalize(agg) * ||r||_2 * scale, then conv residual + r
        inv_norm = jax.lax.rsqrt(
            jnp.maximum(jnp.sum(agg * agg, axis=-1, keepdims=True), 1e-24))
        r = r_f32_ref[...]
        r_norm = jnp.sqrt(jnp.sum(r * r, axis=-1, keepdims=True))
        o_ref[...] = agg * inv_norm * r_norm * scale + r


def pallas_gen_aggregate(r, e_bf16, src2d, dst2d, *, t, scale, tile_e=512):
    n, h = r.shape
    e_pad = e_bf16.shape[0]
    e_tiles = e_pad // tile_e
    # t / scale are learned per-layer scalars, baked as compile-time constants
    # (frozen-inference only).
    kern = functools.partial(_gen_agg_kernel, t=float(t), scale=float(scale),
                             n_nodes=n)
    return pl.pallas_call(
        kern,
        out_shape=jax.ShapeDtypeStruct((n, h), jnp.float32),
        grid=(e_tiles,),
        in_specs=[
            pl.BlockSpec((tile_e, 1), lambda j: (j, 0)),   # src indices
            pl.BlockSpec((1, tile_e), lambda j: (0, j)),   # dst indices
            pl.BlockSpec((n, h), lambda j: (0, 0)),        # node feats bf16 (gather)
            pl.BlockSpec((n, h), lambda j: (0, 0)),        # node feats f32 (finalize)
            pl.BlockSpec((tile_e, h), lambda j: (j, 0)),   # edge feats bf16
        ],
        out_specs=pl.BlockSpec((n, h), lambda j: (0, 0)),
        scratch_shapes=[
            pltpu.VMEM((n, h), jnp.float32),               # denom accumulator
            pltpu.VMEM((n, h), jnp.float32),               # weighted-sum accumulator
            pltpu.VMEM((1, h), jnp.float32),               # running channel max
        ],
        compiler_params=pltpu.CompilerParams(
            dimension_semantics=("arbitrary",)),
        cost_estimate=pl.CostEstimate(
            flops=6 * e_pad * n * h,                       # gather + 2 scatter matmuls
            transcendentals=2 * e_pad * h,
            bytes_accessed=4 * 4 * n * h + 2 * (n * h + e_pad * h) + 8 * e_pad),
    )(src2d, dst2d, r.astype(jnp.bfloat16), r, e_bf16)


# --------- fused GENConv MLP (Lin->LN->ReLU->Lin) + res+ + next LN/ReLU ------

def _genconv_mlp_kernel(*refs, eps, add_residual):
    if add_residual:
        (pre_ref, res_ref, w1_ref, b1_ref, g1_ref, c1_ref,
         w2_ref, b2_ref, gn_ref, cn_ref, x_out_ref, r_out_ref) = refs
    else:
        (pre_ref, w1_ref, b1_ref, g1_ref, c1_ref,
         w2_ref, b2_ref, gn_ref, cn_ref, x_out_ref, r_out_ref) = refs
        res_ref = None

    z = jnp.dot(pre_ref[...].astype(jnp.bfloat16), w1_ref[...],
                preferred_element_type=jnp.float32) + b1_ref[...]
    mu = jnp.mean(z, axis=-1, keepdims=True)
    var = jnp.mean((z - mu) ** 2, axis=-1, keepdims=True)
    z = (z - mu) * jax.lax.rsqrt(var + eps) * g1_ref[...] + c1_ref[...]
    z = jnp.maximum(z, 0.0)
    out = jnp.dot(z.astype(jnp.bfloat16), w2_ref[...],
                  preferred_element_type=jnp.float32) + b2_ref[...]
    if add_residual:
        out = out + res_ref[...]
    x_out_ref[...] = out

    # fused next-layer (or final) LayerNorm + ReLU on the residual stream
    mu2 = jnp.mean(out, axis=-1, keepdims=True)
    var2 = jnp.mean((out - mu2) ** 2, axis=-1, keepdims=True)
    y = (out - mu2) * jax.lax.rsqrt(var2 + eps) * gn_ref[...] + cn_ref[...]
    r_out_ref[...] = jnp.maximum(y, 0.0)


def pallas_genconv_mlp(pre, res, w1, b1, g1, c1, w2, b2, gn, cn, *,
                       add_residual, eps=1e-5, row_tile=512):
    n, h = pre.shape
    h2 = w1.shape[1]
    tn = _row_tile(n, row_tile)
    kern = functools.partial(_genconv_mlp_kernel, eps=eps,
                             add_residual=add_residual)
    row_spec = pl.BlockSpec((tn, h), lambda i: (i, 0))
    vec = lambda d: pl.BlockSpec((1, d), lambda i: (0, 0))

    in_specs = [row_spec]
    args = [pre]
    if add_residual:
        in_specs.append(row_spec)
        args.append(res)
    in_specs += [pl.BlockSpec((h, h2), lambda i: (0, 0)), vec(h2), vec(h2),
                 vec(h2), pl.BlockSpec((h2, h), lambda i: (0, 0)), vec(h),
                 vec(h), vec(h)]
    args += [w1.astype(jnp.bfloat16), b1.reshape(1, h2), g1.reshape(1, h2),
             c1.reshape(1, h2), w2.astype(jnp.bfloat16), b2.reshape(1, h),
             gn.reshape(1, h), cn.reshape(1, h)]

    x_new, r_next = pl.pallas_call(
        kern,
        out_shape=(jax.ShapeDtypeStruct((n, h), jnp.float32),
                   jax.ShapeDtypeStruct((n, h), jnp.float32)),
        grid=(n // tn,),
        in_specs=in_specs,
        out_specs=(pl.BlockSpec((tn, h), lambda i: (i, 0)),
                   pl.BlockSpec((tn, h), lambda i: (i, 0))),
        compiler_params=pltpu.CompilerParams(dimension_semantics=("parallel",)),
        cost_estimate=pl.CostEstimate(
            flops=4 * n * h * h2, transcendentals=2 * n,
            bytes_accessed=4 * (5 * n * h + 2 * h * h2 + 4 * h2)),
    )(*args)
    return x_new, r_next


# ------------------------------ model wrapper --------------------------------

def init_params(key, node_feat, edge_feat, hidden, out_dim, num_layers):
    def lin_init(k, fan_in, fan_out):
        kw, kb = jax.random.split(k)
        w = jax.random.normal(kw, (fan_in, fan_out), jnp.float32) * 0.1
        b = jax.random.normal(kb, (fan_out,), jnp.float32) * 0.01
        return w, b

    keys = jax.random.split(key, 3 + num_layers)
    node_w, node_b = lin_init(keys[0], node_feat, hidden)
    edge_w, edge_b = lin_init(keys[1], edge_feat, hidden)
    out_w, out_b = lin_init(keys[2], hidden, out_dim)

    layers = []
    for li in range(num_layers):
        lk = jax.random.split(keys[3 + li], 2)
        w1, b1 = lin_init(lk[0], hidden, 2 * hidden)
        w2, b2 = lin_init(lk[1], 2 * hidden, hidden)
        layers.append(dict(
            # DeepGCNLayer LayerNorm (elementwise_affine init: gamma=1, beta=0)
            ln_g=jnp.ones((hidden,), jnp.float32),
            ln_b=jnp.zeros((hidden,), jnp.float32),
            # GENConv MLP: Linear(H,2H) -> LayerNorm(2H) -> ReLU -> Linear(2H,H)
            mlp_w1=w1, mlp_b1=b1,
            mlp_ln_g=jnp.ones((2 * hidden,), jnp.float32),
            mlp_ln_b=jnp.zeros((2 * hidden,), jnp.float32),
            mlp_w2=w2, mlp_b2=b2,
            t=1.0,       # learn_t=True, init t=1.0
            scale=1.0,   # MessageNorm scale init 1.0
        ))
    return dict(node_w=node_w, node_b=node_b, edge_w=edge_w, edge_b=edge_b,
                out_w=out_w, out_b=out_b, layers=layers)


def deeper_gcn_forward(x, edge_index, edge_attr, params, *, tile_e=512):
    n_edges = edge_index.shape[1]
    e_pad = _round_up(n_edges, tile_e)

    src = edge_index[0].astype(jnp.int32)
    dst = edge_index[1].astype(jnp.int32)
    if e_pad != n_edges:
        fill = -jnp.ones((e_pad - n_edges,), jnp.int32)   # -1 matches no node
        src = jnp.concatenate([src, fill])
        dst = jnp.concatenate([dst, fill])
        edge_attr = jnp.pad(edge_attr, ((0, e_pad - n_edges), (0, 0)))
    src2d = src.reshape(e_pad, 1)                         # sublane-major gather ids
    dst2d = dst.reshape(1, e_pad)                         # lane-major scatter ids

    # TODO(synk): node & edge encoders could share one pallas_call; kept separate
    # (different row counts / weights), cost is negligible at this size.
    h = pallas_linear(x, params["node_w"], params["node_b"])
    e_bf16 = pallas_linear(edge_attr, params["edge_w"], params["edge_b"],
                           out_dtype=jnp.bfloat16)        # streamed bf16 into aggr

    layers = params["layers"]
    num_layers = len(layers)

    r = h            # conv input of layer 0 is the encoded node features
    xres = None      # residual stream x
    for li, lp in enumerate(layers):
        pre = pallas_gen_aggregate(r, e_bf16, src2d, dst2d,
                                   t=lp["t"], scale=lp["scale"], tile_e=tile_e)
        # LayerNorm applied to the updated residual stream: next layer's norm,
        # or layer-0's norm after the last layer (matches the reference head).
        nxt = layers[li + 1] if li + 1 < num_layers else layers[0]
        # TODO(synk): dropout(p=0.1) omitted — module evaluated with training=False
        xres, r = pallas_genconv_mlp(
            pre, xres if li > 0 else pre,
            lp["mlp_w1"], lp["mlp_b1"], lp["mlp_ln_g"], lp["mlp_ln_b"],
            lp["mlp_w2"], lp["mlp_b2"], nxt["ln_g"], nxt["ln_b"],
            add_residual=(li > 0))

    out_dim = params["out_w"].shape[1]
    out = pallas_linear(r, params["out_w"], params["out_b"])   # lane-padded head
    return out[:, :out_dim]                                    # single slice at caller


# ---------------------------------- main -------------------------------------

if __name__ == "__main__":
    key = jax.random.PRNGKey(0)
    N_NODES, N_EDGES = 512, 1000
    NODE_FEAT, EDGE_FEAT = 8, 8                # ogbn-proteins: 8-dim node & edge feats
    HIDDEN, OUT_DIM, NUM_LAYERS = 128, 112, 3  # 112 = ogbn-proteins label dim

    k_x, k_ei, k_ea, k_p = jax.random.split(key, 4)
    x = jax.random.normal(k_x, (N_NODES, NODE_FEAT), jnp.float32)
    edge_index = jax.random.randint(k_ei, (2, N_EDGES), 0, N_NODES, jnp.int32)
    edge_attr = jax.random.normal(k_ea, (N_EDGES, EDGE_FEAT), jnp.float32)

    params = init_params(k_p, NODE_FEAT, EDGE_FEAT, HIDDEN, OUT_DIM, NUM_LAYERS)

    out = deeper_gcn_forward(x, edge_index, edge_attr, params)
    jax.block_until_ready(out)
    assert out.shape == (N_NODES, OUT_DIM)
    assert bool(jnp.all(jnp.isfinite(out)))
    print("KERNEL_OK")
</pallas_src>

<mosaic_0001>
module attributes {stable_mosaic.version = 11 : i64} {
  func.func @_linear_kernel(%arg0: i32, %arg1: memref<512x8xf32, #tpu.memory_space<vmem>>, %arg2: memref<8x128xf32, #tpu.memory_space<vmem>>, %arg3: memref<1x128xf32, #tpu.memory_space<vmem>>, %arg4: memref<512x128xf32, #tpu.memory_space<vmem>>) attributes {dimension_semantics = [#tpu.dimension_semantics<parallel>], iteration_bounds = array<i64: 1>, scalar_prefetch = 0 : i64, scratch_operands = 0 : i64, tpu.core_type = #tpu.core_type<tc>, window_params = [{transform_indices = @transform_0, window_bounds = array<i64: 512, 8>}, {pipeline_mode = #tpu.pipeline_mode<synchronous>, transform_indices = @transform_1, window_bounds = array<i64: 8, 128>}, {pipeline_mode = #tpu.pipeline_mode<synchronous>, transform_indices = @transform_2, window_bounds = array<i64: 1, 128>}, {transform_indices = @transform_3, window_bounds = array<i64: 512, 128>}]} {
    %c0 = arith.constant 0 : index
    %c0_0 = arith.constant 0 : index
    %0 = vector.load %arg1[%c0, %c0_0] : memref<512x8xf32, #tpu.memory_space<vmem>>, vector<512x8xf32>
    %c0_1 = arith.constant 0 : index
    %c0_2 = arith.constant 0 : index
    %1 = vector.load %arg2[%c0_1, %c0_2] : memref<8x128xf32, #tpu.memory_space<vmem>>, vector<8x128xf32>
    %cst = arith.constant dense<0.000000e+00> : vector<512x128xf32>
    %2 = tpu.matmul %0, %1, %cst {dimension_numbers = #tpu.dot_dimension_numbers<[1], [0], [0], [1], [0, 0, 1, 1], [], []>} : vector<512x8xf32>, vector<8x128xf32>, vector<512x128xf32> -> vector<512x128xf32>
    %c0_3 = arith.constant 0 : index
    %c0_4 = arith.constant 0 : index
    %3 = vector.load %arg3[%c0_3, %c0_4] : memref<1x128xf32, #tpu.memory_space<vmem>>, vector<1x128xf32>
    %4 = vector.broadcast %3 : vector<1x128xf32> to vector<512x128xf32>
    %5 = arith.addf %2, %4 : vector<512x128xf32>
    %c0_5 = arith.constant 0 : index
    %c0_6 = arith.constant 0 : index
    %6 = vector.load %arg4[%c0_5, %c0_6] : memref<512x128xf32, #tpu.memory_space<vmem>>, vector<512x128xf32>
    tpu.vector_store %arg4[%c0_5, %c0_6], %5 {strides = array<i32>} : memref<512x128xf32, #tpu.memory_space<vmem>>, vector<512x128xf32>,
    return
  }
  func.func @transform_0(%arg0: i32) -> (i32, i32) {
    %c0_i32 = arith.constant 0 : i32
    %c0_i32_0 = arith.constant 0 : i32
    return %arg0, %c0_i32 : i32, i32
  }
  func.func @transform_1(%arg0: i32) -> (i32, i32) {
    %c0_i32 = arith.constant 0 : i32
    %c0_i32_0 = arith.constant 0 : i32
    %c0_i32_1 = arith.constant 0 : i32
    return %c0_i32, %c0_i32_0 : i32, i32
  }
  func.func @transform_2(%arg0: i32) -> (i32, i32) {
    %c0_i32 = arith.constant 0 : i32
    %c0_i32_0 = arith.constant 0 : i32
    %c0_i32_1 = arith.constant 0 : i32
    return %c0_i32, %c0_i32_0 : i32, i32
  }
  func.func @transform_3(%arg0: i32) -> (i32, i32) {
    %c0_i32 = arith.constant 0 : i32
    %c0_i32_0 = arith.constant 0 : i32
    return %arg0, %c0_i32 : i32, i32
  }
}

</mosaic_0001>

<bundles_post_ra>
// kernel: tpu_custom_call.1
= control target key start
LH: loop header
LB: loop body
LE: loop exit
PB: predicated region body
PF: predicated region fallthrough
CT: control target
= control target key end

     0   :  { %vm87_vm0 = vcmask 64512   ;;  %s1354_s0 = inlined_call_operand.vmem [shape: f32[512,8], index: 0, kind: input, shape index: {}]   ;;  %s1355_s1 = inlined_call_operand.vmem [shape: f32[8,128], index: 1, kind: input, shape index: {}]   ;;  %s1356_s2 = inlined_call_operand.vmem [shape: f32[1,128], index: 2, kind: input, shape index: {}]   ;;  %s1357_s3 = inlined_call_operand.hbm [shape: f32[512,128], index: 3, kind: output, shape index: {}]  }
   0x1   :  { %v79_v0 = vld [vmem:[%s1355_s1] sm:$0xff]  ;;  %v16_v3 = vld [vmem:[%s1354_s0 + $0x8] sm:$0xff]  ;;  %v17_v5 = vld [vmem:[%s1354_s0 + $0x10] sm:$0xff] }
   0x2   :  { %v15_v1 = vld [vmem:[%s1354_s0] sm:$0xff]  ;;  %875 = vmatprep.subr.mxu0 %v79_v0  ;;  %973 = vmatprep.subr.mxu1 %v79_v0  ;;  %v48_v4 = vld [vmem:[%s1354_s0 + $0x108] sm:$0xff]  ;;  %v49_v6 = vld [vmem:[%s1354_s0 + $0x110] sm:$0xff] }
   0x3   :  { %v47_v2 = vld [vmem:[%s1354_s0 + $0x100] sm:$0xff]  ;;  %876 = vmatpush3.msra.mxu0 %v79_v0  ;;  %974 = vmatpush3.msra.mxu1 %v79_v0  ;;  %v18_v7 = vld [vmem:[%s1354_s0 + $0x18] sm:$0xff]  ;;  %v20_v11 = vld [vmem:[%s1354_s0 + $0x28] sm:$0xff] }
   0x4   :  { %877 = vmatprep.mubr.msk.f32.mxu0 %vm87_vm0, %v15_v1  ;;  %925 = vmatprep.mubr.msk.f32.mxu1 %vm87_vm0, %v47_v2  ;;  %v50_v8 = vld [vmem:[%s1354_s0 + $0x118] sm:$0xff]  ;;  %v19_v9 = vld [vmem:[%s1354_s0 + $0x20] sm:$0xff]  ;;  %v52_v12 = vld [vmem:[%s1354_s0 + $0x128] sm:$0xff] }
   0x5   :  { %878 = vmatmul.mubr.msk.f32.vlgmr.msra.gmra.mxu0 %vm87_vm0, %v16_v3  ;;  %926 = vmatmul.mubr.msk.f32.vlgmr.msra.gmra.mxu1 %vm87_vm0, %v48_v4  ;;  %v51_v10 = vld [vmem:[%s1354_s0 + $0x120] sm:$0xff]  ;;  %v21_v13 = vld [vmem:[%s1354_s0 + $0x30] sm:$0xff]  ;;  %v22_v15 = vld [vmem:[%s1354_s0 + $0x38] sm:$0xff] }
   0x6   :  { %880 = vmatprep.mubr.msk.f32.mxu0 %vm87_vm0, %v17_v5  ;;  %928 = vmatprep.mubr.msk.f32.mxu1 %vm87_vm0, %v49_v6  ;;  %v53_v14 = vld [vmem:[%s1354_s0 + $0x130] sm:$0xff]  ;;  %v54_v16 = vld [vmem:[%s1354_s0 + $0x138] sm:$0xff]  ;;  %v23_v17 = vld [vmem:[%s1354_s0 + $0x40] sm:$0xff] }
   0x7   :  { %v55_v18 = vld [vmem:[%s1354_s0 + $0x140] sm:$0xff]  ;;  %v24_v19 = vld [vmem:[%s1354_s0 + $0x48] sm:$0xff]  ;;  %v25_v21 = vld [vmem:[%s1354_s0 + $0x50] sm:$0xff] }
   0x8   :  { %v56_v20 = vld [vmem:[%s1354_s0 + $0x148] sm:$0xff]  ;;  %v57_v22 = vld [vmem:[%s1354_s0 + $0x150] sm:$0xff]  ;;  %v26_v23 = vld [vmem:[%s1354_s0 + $0x58] sm:$0xff] }
   0x9   :  { %881 = vmatmul.mubr.msk.f32.gmra.mxu0 %vm87_vm0, %v18_v7  ;;  %929 = vmatmul.mubr.msk.f32.gmra.mxu1 %vm87_vm0, %v50_v8  ;;  %v58_v24 = vld [vmem:[%s1354_s0 + $0x158] sm:$0xff] }
   0xa   :  { %883 = vmatprep.mubr.msk.f32.mxu0 %vm87_vm0, %v19_v9  ;;  %931 = vmatprep.mubr.msk.f32.mxu1 %vm87_vm0, %v51_v10 }
   0xd   :  { %884 = vmatmul.mubr.msk.f32.gmra.mxu0 %vm87_vm0, %v20_v11  ;;  %932 = vmatmul.mubr.msk.f32.gmra.mxu1 %vm87_vm0, %v52_v12 }
   0xe   :  { %886 = vmatprep.mubr.msk.f32.mxu0 %vm87_vm0, %v21_v13  ;;  %934 = vmatprep.mubr.msk.f32.mxu1 %vm87_vm0, %v53_v14 }
  0x11   :  { %887 = vmatmul.mubr.msk.f32.gmra.mxu0 %vm87_vm0, %v22_v15  ;;  %935 = vmatmul.mubr.msk.f32.gmra.mxu1 %vm87_vm0, %v54_v16 }
  0x12   :  { %889 = vmatprep.mubr.msk.f32.mxu0 %vm87_vm0, %v23_v17  ;;  %937 = vmatprep.mubr.msk.f32.mxu1 %vm87_vm0, %v55_v18 }
  0x15   :  { %890 = vmatmul.mubr.msk.f32.gmra.mxu0 %vm87_vm0, %v24_v19  ;;  %938 = vmatmul.mubr.msk.f32.gmra.mxu1 %vm87_vm0, %v56_v20 }
  0x16   :  { %892 = vmatprep.mubr.msk.f32.mxu0 %vm87_vm0, %v25_v21  ;;  %940 = vmatprep.mubr.msk.f32.mxu1 %vm87_vm0, %v57_v22 }
  0x17   :  { %8 = vsyncpa [#allocation3], 0  ;;  %v27_v25 = vld [vmem:[%s1354_s0 + $0x60] sm:$0xff]  ;;  %v28_v27 = vld [vmem:[%s1354_s0 + $0x68] sm:$0xff] }
  0x18   :  { %v59_v26 = vld [vmem:[%s1354_s0 + $0x160] sm:$0xff]  ;;  %v60_v28 = vld [vmem:[%s1354_s0 + $0x168] sm:$0xff]  ;;  %v29_v29 = vld [vmem:[%s1354_s0 + $0x70] sm:$0xff] }
  0x19   :  { %893 = vmatmul.mubr.msk.f32.gmra.mxu0 %vm87_vm0, %v26_v23  ;;  %941 = vmatmul.mubr.msk.f32.gmra.mxu1 %vm87_vm0, %v58_v24  ;;  %v61_v30 = vld [vmem:[%s1354_s0 + $0x170] sm:$0xff]  ;;  %v30_v31 = vld [vmem:[%s1354_s0 + $0x78] sm:$0xff]  ;;  %v31_v33 = vld [vmem:[%s1354_s0 + $0x80] sm:$0xff] }
  0x1a   :  { %895 = vmatprep.mubr.msk.f32.mxu0 %vm87_vm0, %v27_v25  ;;  %943 = vmatprep.mubr.msk.f32.mxu1 %vm87_vm0, %v59_v26  ;;  %v62_v32 = vld [vmem:[%s1354_s0 + $0x178] sm:$0xff]  ;;  %v63_v34 = vld [vmem:[%s1354_s0 + $0x180] sm:$0xff]  ;;  %v32_v35 = vld [vmem:[%s1354_s0 + $0x88] sm:$0xff] }
  0x1b   :  { %v64_v36 = vld [vmem:[%s1354_s0 + $0x188] sm:$0xff]  ;;  %v33_v37 = vld [vmem:[%s1354_s0 + $0x90] sm:$0xff]  ;;  %v34_v39 = vld [vmem:[%s1354_s0 + $0x98] sm:$0xff] }
  0x1c   :  { %v65_v38 = vld [vmem:[%s1354_s0 + $0x190] sm:$0xff]  ;;  %v66_v40 = vld [vmem:[%s1354_s0 + $0x198] sm:$0xff]  ;;  %v35_v41 = vld [vmem:[%s1354_s0 + $0xa0] sm:$0xff] }
  0x1d   :  { %896 = vmatmul.mubr.msk.f32.gmra.mxu0 %vm87_vm0, %v28_v27  ;;  %944 = vmatmul.mubr.msk.f32.gmra.mxu1 %vm87_vm0, %v60_v28  ;;  %v67_v42 = vld [vmem:[%s1354_s0 + $0x1a0] sm:$0xff]  ;;  %v36_v43 = vld [vmem:[%s1354_s0 + $0xa8] sm:$0xff]  ;;  %v37_v45 = vld [vmem:[%s1354_s0 + $0xb0] sm:$0xff] }
  0x1e   :  { %898 = vmatprep.mubr.msk.f32.mxu0 %vm87_vm0, %v29_v29  ;;  %946 = vmatprep.mubr.msk.f32.mxu1 %vm87_vm0, %v61_v30  ;;  %v68_v44 = vld [vmem:[%s1354_s0 + $0x1a8] sm:$0xff]  ;;  %v69_v46 = vld [vmem:[%s1354_s0 + $0x1b0] sm:$0xff]  ;;  %v38_v47 = vld [vmem:[%s1354_s0 + $0xb8] sm:$0xff] }
  0x1f   :  { %v70_v48 = vld [vmem:[%s1354_s0 + $0x1b8] sm:$0xff]  ;;  %v39_v49 = vld [vmem:[%s1354_s0 + $0xc0] sm:$0xff]  ;;  %v40_v51 = vld [vmem:[%s1354_s0 + $0xc8] sm:$0xff] }
  0x20   :  { %v71_v50 = vld [vmem:[%s1354_s0 + $0x1c0] sm:$0xff]  ;;  %v72_v52 = vld [vmem:[%s1354_s0 + $0x1c8] sm:$0xff]  ;;  %v41_v53 = vld [vmem:[%s1354_s0 + $0xd0] sm:$0xff] }
  0x21   :  { %899 = vmatmul.mubr.msk.f32.gmra.mxu0 %vm87_vm0, %v30_v31  ;;  %947 = vmatmul.mubr.msk.f32.gmra.mxu1 %vm87_vm0, %v62_v32  ;;  %v73_v54 = vld [vmem:[%s1354_s0 + $0x1d0] sm:$0xff]  ;;  %v42_v55 = vld [vmem:[%s1354_s0 + $0xd8] sm:$0xff]  ;;  %v43_v57 = vld [vmem:[%s1354_s0 + $0xe0] sm:$0xff] }
  0x22   :  { %901 = vmatprep.mubr.msk.f32.mxu0 %vm87_vm0, %v31_v33  ;;  %949 = vmatprep.mubr.msk.f32.mxu1 %vm87_vm0, %v63_v34  ;;  %v74_v56 = vld [vmem:[%s1354_s0 + $0x1d8] sm:$0xff]  ;;  %v75_v58 = vld [vmem:[%s1354_s0 + $0x1e0] sm:$0xff]  ;;  %v44_v59 = vld [vmem:[%s1354_s0 + $0xe8] sm:$0xff] }
  0x23   :  { %v76_v60 = vld [vmem:[%s1354_s0 + $0x1e8] sm:$0xff]  ;;  %v45_v61 = vld [vmem:[%s1354_s0 + $0xf0] sm:$0xff]  ;;  %v46_v63 = vld [vmem:[%s1354_s0 + $0xf8] sm:$0xff] }
  0x24   :  { %v77_v62 = vld [vmem:[%s1354_s0 + $0x1f0] sm:$0xff]  ;;  %v78_v0 = vld [vmem:[%s1354_s0 + $0x1f8] sm:$0xff]  ;;  %v1285_v1 = vld [vmem:[%s1356_s2] ss:$0 sm:$0xff]  ;;  %s1000_s0 = smov [#allocation2]  }
  0x25   :  { %902 = vmatmul.mubr.msk.f32.gmra.mxu0 %vm87_vm0, %v32_v35  ;;  %950 = vmatmul.mubr.msk.f32.gmra.mxu1 %vm87_vm0, %v64_v36  ;;  %s734_s2 = sshll.u32 %s1000_s0, 4  ;;  %s735_s2 = int_to_ptr.vmem [resolvable:$true] %s734_s2 }
  0x26   :  { %904 = vmatprep.mubr.msk.f32.mxu0 %vm87_vm0, %v33_v37  ;;  %952 = vmatprep.mubr.msk.f32.mxu1 %vm87_vm0, %v65_v38  ;;  %s978_s4 = scalar_lea.vmem %s735_s2, 8192  ;;  %p983_p1 = scmp.lt.s32.totalorder %s735_s2, %s735_s2 }
  0x27   :  { %p979_p0 = scmp.ne.s32.totalorder %s735_s2, %s978_s4  ;;  %p984_p2 = scmp.lt.s32.totalorder %s978_s4, %s978_s4 }
  0x29   :  { %905 = vmatmul.mubr.msk.f32.gmra.mxu0 %vm87_vm0, %v34_v39  ;;  %953 = vmatmul.mubr.msk.f32.gmra.mxu1 %vm87_vm0, %v66_v40  ;;  %p985_p3 = por %p984_p2, %p983_p1 }
  0x2a   :  { %907 = vmatprep.mubr.msk.f32.mxu0 %vm87_vm0, %v35_v41  ;;  %955 = vmatprep.mubr.msk.f32.mxu1 %vm87_vm0, %v67_v42 }
  0x2b   :  { %p986_p4 = pnand %p985_p3, %p979_p0 }
  0x2d   :  { %908 = vmatmul.mubr.msk.f32.gmra.mxu0 %vm87_vm0, %v36_v43  ;;  %956 = vmatmul.mubr.msk.f32.gmra.mxu1 %vm87_vm0, %v68_v44 }
  0x2e   :  { %910 = vmatprep.mubr.msk.f32.mxu0 %vm87_vm0, %v37_v45  ;;  %958 = vmatprep.mubr.msk.f32.mxu1 %vm87_vm0, %v69_v46 }
  0x31   :  { %911 = vmatmul.mubr.msk.f32.gmra.mxu0 %vm87_vm0, %v38_v47  ;;  %959 = vmatmul.mubr.msk.f32.gmra.mxu1 %vm87_vm0, %v70_v48 }
  0x32   :  { %913 = vmatprep.mubr.msk.f32.mxu0 %vm87_vm0, %v39_v49  ;;  %961 = vmatprep.mubr.msk.f32.mxu1 %vm87_vm0, %v71_v50 }
  0x35   :  { %914 = vmatmul.mubr.msk.f32.gmra.mxu0 %vm87_vm0, %v40_v51  ;;  %962 = vmatmul.mubr.msk.f32.gmra.mxu1 %vm87_vm0, %v72_v52 }
  0x36   :  { %916 = vmatprep.mubr.msk.f32.mxu0 %vm87_vm0, %v41_v53  ;;  %964 = vmatprep.mubr.msk.f32.mxu1 %vm87_vm0, %v73_v54 }
  0x39   :  { %917 = vmatmul.mubr.msk.f32.gmra.mxu0 %vm87_vm0, %v42_v55  ;;  %965 = vmatmul.mubr.msk.f32.gmra.mxu1 %vm87_vm0, %v74_v56 }
  0x3a   :  { %919 = vmatprep.mubr.msk.f32.mxu0 %vm87_vm0, %v43_v57  ;;  %967 = vmatprep.mubr.msk.f32.mxu1 %vm87_vm0, %v75_v58 }
  0x3d   :  { %920 = vmatmul.mubr.msk.f32.gmra.mxu0 %vm87_vm0, %v44_v59  ;;  %968 = vmatmul.mubr.msk.f32.gmra.mxu1 %vm87_vm0, %v76_v60 }
  0x3e   :  { %922 = vmatprep.mubr.msk.f32.mxu0 %vm87_vm0, %v45_v61  ;;  %970 = vmatprep.mubr.msk.f32.mxu1 %vm87_vm0, %v77_v62 }
  0x41   :  { %923 = vmatmul.mubr.msk.f32.gmra.mxu0 %vm87_vm0, %v46_v63  ;;  %971 = vmatmul.mubr.msk.f32.gmra.mxu1 %vm87_vm0, %v78_v0 }
  0xc5   :  { %v879_v2 = vpop.f32.mrf.mxu0  ;;  %v927_v3 = vpop.f32.mrf.mxu1 }
  0xc6   :  { %v352_v4 = vadd.f32 %v879_v2, %v1285_v1  ;;  %v512_v5 = vadd.f32 %v927_v3, %v1285_v1 }
  0xc7   :  { %v346_v6 = vpop.f32.mrf.mxu0  ;;  %v506_v7 = vpop.f32.mrf.mxu1 }
  0xc8   :  { %666 = vst [vmem:[#allocation2 + $0x8] sm:$0xff] %v352_v4  ;;  %698 = vst [vmem:[#allocation2 + $0x108] sm:$0xff] %v512_v5  ;;  %v347_v8 = vadd.f32 %v1285_v1, %v346_v6  ;;  %v507_v9 = vadd.f32 %v1285_v1, %v506_v7 }
  0xc9   :  { %v882_v10 = vpop.f32.mrf.mxu0  ;;  %v930_v11 = vpop.f32.mrf.mxu1 }
  0xca   :  { %665 = vst [vmem:[#allocation2] sm:$0xff] %v347_v8  ;;  %697 = vst [vmem:[#allocation2 + $0x100] sm:$0xff] %v507_v9  ;;  %v362_v12 = vadd.f32 %v882_v10, %v1285_v1  ;;  %v522_v13 = vadd.f32 %v930_v11, %v1285_v1 }
  0xcb   :  { %v356_v14 = vpop.f32.mrf.mxu0  ;;  %v516_v15 = vpop.f32.mrf.mxu1 }
  0xcc   :  { %668 = vst [vmem:[#allocation2 + $0x18] sm:$0xff] %v362_v12  ;;  %700 = vst [vmem:[#allocation2 + $0x118] sm:$0xff] %v522_v13  ;;  %v357_v16 = vadd.f32 %v1285_v1, %v356_v14  ;;  %v517_v17 = vadd.f32 %v1285_v1, %v516_v15 }
  0xcd   :  { %v885_v18 = vpop.f32.mrf.mxu0  ;;  %v933_v19 = vpop.f32.mrf.mxu1 }
  0xce   :  { %667 = vst [vmem:[#allocation2 + $0x10] sm:$0xff] %v357_v16  ;;  %699 = vst [vmem:[#allocation2 + $0x110] sm:$0xff] %v517_v17  ;;  %v372_v20 = vadd.f32 %v885_v18, %v1285_v1  ;;  %v532_v21 = vadd.f32 %v933_v19, %v1285_v1 }
  0xcf   :  { %v366_v22 = vpop.f32.mrf.mxu0  ;;  %v526_v23 = vpop.f32.mrf.mxu1 }
  0xd0   :  { %670 = vst [vmem:[#allocation2 + $0x28] sm:$0xff] %v372_v20  ;;  %702 = vst [vmem:[#allocation2 + $0x128] sm:$0xff] %v532_v21  ;;  %v367_v24 = vadd.f32 %v1285_v1, %v366_v22  ;;  %v527_v25 = vadd.f32 %v1285_v1, %v526_v23 }
  0xd1   :  { %v888_v26 = vpop.f32.mrf.mxu0  ;;  %v936_v27 = vpop.f32.mrf.mxu1 }
  0xd2   :  { %669 = vst [vmem:[#allocation2 + $0x20] sm:$0xff] %v367_v24  ;;  %701 = vst [vmem:[#allocation2 + $0x120] sm:$0xff] %v527_v25  ;;  %v382_v28 = vadd.f32 %v888_v26, %v1285_v1  ;;  %v542_v29 = vadd.f32 %v936_v27, %v1285_v1 }
  0xd3   :  { %v376_v30 = vpop.f32.mrf.mxu0  ;;  %v536_v31 = vpop.f32.mrf.mxu1 }
  0xd4   :  { %672 = vst [vmem:[#allocation2 + $0x38] sm:$0xff] %v382_v28  ;;  %704 = vst [vmem:[#allocation2 + $0x138] sm:$0xff] %v542_v29  ;;  %v377_v32 = vadd.f32 %v1285_v1, %v376_v30  ;;  %v537_v33 = vadd.f32 %v1285_v1, %v536_v31 }
  0xd5   :  { %v891_v34 = vpop.f32.mrf.mxu0  ;;  %v939_v35 = vpop.f32.mrf.mxu1 }
  0xd6   :  { %671 = vst [vmem:[#allocation2 + $0x30] sm:$0xff] %v377_v32  ;;  %703 = vst [vmem:[#allocation2 + $0x130] sm:$0xff] %v537_v33  ;;  %v392_v36 = vadd.f32 %v891_v34, %v1285_v1  ;;  %v552_v37 = vadd.f32 %v939_v35, %v1285_v1 }
  0xd7   :  { %v386_v38 = vpop.f32.mrf.mxu0  ;;  %v546_v39 = vpop.f32.mrf.mxu1 }
  0xd8   :  { %674 = vst [vmem:[#allocation2 + $0x48] sm:$0xff] %v392_v36  ;;  %706 = vst [vmem:[#allocation2 + $0x148] sm:$0xff] %v552_v37  ;;  %v387_v40 = vadd.f32 %v1285_v1, %v386_v38  ;;  %v547_v41 = vadd.f32 %v1285_v1, %v546_v39 }
  0xd9   :  { %v894_v42 = vpop.f32.mrf.mxu0  ;;  %v942_v43 = vpop.f32.mrf.mxu1 }
  0xda   :  { %673 = vst [vmem:[#allocation2 + $0x40] sm:$0xff] %v387_v40  ;;  %705 = vst [vmem:[#allocation2 + $0x140] sm:$0xff] %v547_v41  ;;  %v402_v44 = vadd.f32 %v894_v42, %v1285_v1  ;;  %v562_v45 = vadd.f32 %v942_v43, %v1285_v1 }
  0xdb   :  { %v396_v46 = vpop.f32.mrf.mxu0  ;;  %v556_v47 = vpop.f32.mrf.mxu1 }
  0xdc   :  { %676 = vst [vmem:[#allocation2 + $0x58] sm:$0xff] %v402_v44  ;;  %708 = vst [vmem:[#allocation2 + $0x158] sm:$0xff] %v562_v45  ;;  %v397_v48 = vadd.f32 %v1285_v1, %v396_v46  ;;  %v557_v49 = vadd.f32 %v1285_v1, %v556_v47 }
  0xdd   :  { %v897_v50 = vpop.f32.mrf.mxu0  ;;  %v945_v51 = vpop.f32.mrf.mxu1 }
  0xde   :  { %675 = vst [vmem:[#allocation2 + $0x50] sm:$0xff] %v397_v48  ;;  %707 = vst [vmem:[#allocation2 + $0x150] sm:$0xff] %v557_v49  ;;  %v412_v52 = vadd.f32 %v897_v50, %v1285_v1  ;;  %v572_v53 = vadd.f32 %v945_v51, %v1285_v1 }
  0xdf   :  { %v406_v54 = vpop.f32.mrf.mxu0  ;;  %v566_v55 = vpop.f32.mrf.mxu1 }
  0xe0   :  { %678 = vst [vmem:[#allocation2 + $0x68] sm:$0xff] %v412_v52  ;;  %710 = vst [vmem:[#allocation2 + $0x168] sm:$0xff] %v572_v53  ;;  %v407_v56 = vadd.f32 %v1285_v1, %v406_v54  ;;  %v567_v57 = vadd.f32 %v1285_v1, %v566_v55 }
  0xe1   :  { %v900_v58 = vpop.f32.mrf.mxu0  ;;  %v948_v59 = vpop.f32.mrf.mxu1 }
  0xe2   :  { %677 = vst [vmem:[#allocation2 + $0x60] sm:$0xff] %v407_v56  ;;  %709 = vst [vmem:[#allocation2 + $0x160] sm:$0xff] %v567_v57  ;;  %v422_v60 = vadd.f32 %v900_v58, %v1285_v1  ;;  %v582_v61 = vadd.f32 %v948_v59, %v1285_v1 }
  0xe3   :  { %v416_v62 = vpop.f32.mrf.mxu0  ;;  %v576_v63 = vpop.f32.mrf.mxu1 }
  0xe4   :  { %680 = vst [vmem:[#allocation2 + $0x78] sm:$0xff] %v422_v60  ;;  %712 = vst [vmem:[#allocation2 + $0x178] sm:$0xff] %v582_v61  ;;  %v417_v0 = vadd.f32 %v1285_v1, %v416_v62  ;;  %v577_v2 = vadd.f32 %v1285_v1, %v576_v63 }
  0xe5   :  { %v903_v3 = vpop.f32.mrf.mxu0  ;;  %v951_v4 = vpop.f32.mrf.mxu1 }
  0xe6   :  { %679 = vst [vmem:[#allocation2 + $0x70] sm:$0xff] %v417_v0  ;;  %711 = vst [vmem:[#allocation2 + $0x170] sm:$0xff] %v577_v2  ;;  %v432_v5 = vadd.f32 %v903_v3, %v1285_v1  ;;  %v592_v6 = vadd.f32 %v951_v4, %v1285_v1 }
  0xe7   :  { %v426_v7 = vpop.f32.mrf.mxu0  ;;  %v586_v8 = vpop.f32.mrf.mxu1 }
  0xe8   :  { %682 = vst [vmem:[#allocation2 + $0x88] sm:$0xff] %v432_v5  ;;  %714 = vst [vmem:[#allocation2 + $0x188] sm:$0xff] %v592_v6  ;;  %v427_v9 = vadd.f32 %v1285_v1, %v426_v7  ;;  %v587_v10 = vadd.f32 %v1285_v1, %v586_v8 }
  0xe9   :  { %v906_v11 = vpop.f32.mrf.mxu0  ;;  %v954_v12 = vpop.f32.mrf.mxu1 }
  0xea   :  { %681 = vst [vmem:[#allocation2 + $0x80] sm:$0xff] %v427_v9  ;;  %713 = vst [vmem:[#allocation2 + $0x180] sm:$0xff] %v587_v10  ;;  %v442_v13 = vadd.f32 %v906_v11, %v1285_v1  ;;  %v602_v14 = vadd.f32 %v954_v12, %v1285_v1 }
  0xeb   :  { %v436_v15 = vpop.f32.mrf.mxu0  ;;  %v596_v16 = vpop.f32.mrf.mxu1 }
  0xec   :  { %684 = vst [vmem:[#allocation2 + $0x98] sm:$0xff] %v442_v13  ;;  %716 = vst [vmem:[#allocation2 + $0x198] sm:$0xff] %v602_v14  ;;  %v437_v17 = vadd.f32 %v1285_v1, %v436_v15  ;;  %v597_v18 = vadd.f32 %v1285_v1, %v596_v16 }
  0xed   :  { %v909_v19 = vpop.f32.mrf.mxu0  ;;  %v957_v20 = vpop.f32.mrf.mxu1 }
  0xee   :  { %683 = vst [vmem:[#allocation2 + $0x90] sm:$0xff] %v437_v17  ;;  %715 = vst [vmem:[#allocation2 + $0x190] sm:$0xff] %v597_v18  ;;  %v452_v21 = vadd.f32 %v909_v19, %v1285_v1  ;;  %v612_v22 = vadd.f32 %v957_v20, %v1285_v1 }
  0xef   :  { %v446_v23 = vpop.f32.mrf.mxu0  ;;  %v606_v24 = vpop.f32.mrf.mxu1 }
  0xf0   :  { %686 = vst [vmem:[#allocation2 + $0xa8] sm:$0xff] %v452_v21  ;;  %718 = vst [vmem:[#allocation2 + $0x1a8] sm:$0xff] %v612_v22  ;;  %v447_v25 = vadd.f32 %v1285_v1, %v446_v23  ;;  %v607_v26 = vadd.f32 %v1285_v1, %v606_v24 }
  0xf1   :  { %v912_v27 = vpop.f32.mrf.mxu0  ;;  %v960_v28 = vpop.f32.mrf.mxu1 }
  0xf2   :  { %685 = vst [vmem:[#allocation2 + $0xa0] sm:$0xff] %v447_v25  ;;  %717 = vst [vmem:[#allocation2 + $0x1a0] sm:$0xff] %v607_v26  ;;  %v462_v29 = vadd.f32 %v912_v27, %v1285_v1  ;;  %v622_v30 = vadd.f32 %v960_v28, %v1285_v1 }
  0xf3   :  { %v456_v31 = vpop.f32.mrf.mxu0  ;;  %v616_v32 = vpop.f32.mrf.mxu1 }
  0xf4   :  { %688 = vst [vmem:[#allocation2 + $0xb8] sm:$0xff] %v462_v29  ;;  %720 = vst [vmem:[#allocation2 + $0x1b8] sm:$0xff] %v622_v30  ;;  %v457_v33 = vadd.f32 %v1285_v1, %v456_v31  ;;  %v617_v34 = vadd.f32 %v1285_v1, %v616_v32 }
  0xf5   :  { %v915_v35 = vpop.f32.mrf.mxu0  ;;  %v963_v36 = vpop.f32.mrf.mxu1 }
  0xf6   :  { %687 = vst [vmem:[#allocation2 + $0xb0] sm:$0xff] %v457_v33  ;;  %719 = vst [vmem:[#allocation2 + $0x1b0] sm:$0xff] %v617_v34  ;;  %v472_v37 = vadd.f32 %v915_v35, %v1285_v1  ;;  %v632_v38 = vadd.f32 %v963_v36, %v1285_v1 }
  0xf7   :  { %v466_v39 = vpop.f32.mrf.mxu0  ;;  %v626_v40 = vpop.f32.mrf.mxu1 }
  0xf8   :  { %690 = vst [vmem:[#allocation2 + $0xc8] sm:$0xff] %v472_v37  ;;  %722 = vst [vmem:[#allocation2 + $0x1c8] sm:$0xff] %v632_v38  ;;  %v467_v41 = vadd.f32 %v1285_v1, %v466_v39  ;;  %v627_v42 = vadd.f32 %v1285_v1, %v626_v40 }
  0xf9   :  { %v918_v43 = vpop.f32.mrf.mxu0  ;;  %v966_v44 = vpop.f32.mrf.mxu1 }
  0xfa   :  { %689 = vst [vmem:[#allocation2 + $0xc0] sm:$0xff] %v467_v41  ;;  %721 = vst [vmem:[#allocation2 + $0x1c0] sm:$0xff] %v627_v42  ;;  %v482_v45 = vadd.f32 %v918_v43, %v1285_v1  ;;  %v642_v46 = vadd.f32 %v966_v44, %v1285_v1 }
  0xfb   :  { %v476_v47 = vpop.f32.mrf.mxu0  ;;  %v636_v48 = vpop.f32.mrf.mxu1 }
  0xfc   :  { %692 = vst [vmem:[#allocation2 + $0xd8] sm:$0xff] %v482_v45  ;;  %724 = vst [vmem:[#allocation2 + $0x1d8] sm:$0xff] %v642_v46  ;;  %v477_v49 = vadd.f32 %v1285_v1, %v476_v47  ;;  %v637_v50 = vadd.f32 %v1285_v1, %v636_v48 }
  0xfd   :  { %v921_v51 = vpop.f32.mrf.mxu0  ;;  %v969_v52 = vpop.f32.mrf.mxu1 }
  0xfe   :  { %691 = vst [vmem:[#allocation2 + $0xd0] sm:$0xff] %v477_v49  ;;  %723 = vst [vmem:[#allocation2 + $0x1d0] sm:$0xff] %v637_v50  ;;  %v492_v53 = vadd.f32 %v921_v51, %v1285_v1  ;;  %v652_v54 = vadd.f32 %v969_v52, %v1285_v1 }
  0xff   :  { %v486_v55 = vpop.f32.mrf.mxu0  ;;  %v646_v56 = vpop.f32.mrf.mxu1 }
 0x100   :  { %694 = vst [vmem:[#allocation2 + $0xe8] sm:$0xff] %v492_v53  ;;  %726 = vst [vmem:[#allocation2 + $0x1e8] sm:$0xff] %v652_v54  ;;  %v487_v57 = vadd.f32 %v1285_v1, %v486_v55  ;;  %v647_v58 = vadd.f32 %v1285_v1, %v646_v56 }
 0x101   :  { %v924_v59 = vpop.f32.mrf.mxu0  ;;  %v972_v60 = vpop.f32.mrf.mxu1 }
 0x102   :  { %693 = vst [vmem:[#allocation2 + $0xe0] sm:$0xff] %v487_v57  ;;  %725 = vst [vmem:[#allocation2 + $0x1e0] sm:$0xff] %v647_v58  ;;  %v502_v61 = vadd.f32 %v924_v59, %v1285_v1  ;;  %v662_v62 = vadd.f32 %v972_v60, %v1285_v1 }
 0x103   :  { %v496_v63 = vpop.f32.mrf.mxu0  ;;  %v656_v0 = vpop.f32.mrf.mxu1 }
 0x104   :  { %696 = vst [vmem:[#allocation2 + $0xf8] sm:$0xff] %v502_v61  ;;  %728 = vst [vmem:[#allocation2 + $0x1f8] sm:$0xff] %v662_v62  ;;  %v497_v2 = vadd.f32 %v1285_v1, %v496_v63  ;;  %v657_v3 = vadd.f32 %v1285_v1, %v656_v0 }
 0x106   :  { %695 = vst [vmem:[#allocation2 + $0xf0] sm:$0xff] %v497_v2  ;;  %727 = vst [vmem:[#allocation2 + $0x1f0] sm:$0xff] %v657_v3 }
 0x107   :  { %989 = shalt.err (!%p986_p4)
}
 0x108   :  { %s1001_s5 = smov 128   ;;  %s1002_s6 = smov 8  }
 0x109   :  { %740 = dma.vmem_to_hbm [thread:$0]  %s735_s2, 8192, %s1357_s3, [#allocation3], %s1001_s5, %s1001_s5, %s1002_s6  }
 0x10a   :  { %998 = dma.done.wait [#allocation3], 8192  }
 0x10b   :  { %999 = vsyncadd [#allocation3], 4294959104 }
 0x10c   :  { %744 = vsyncpa [#allocation3], 1 }

</bundles_post_ra>
